<compile_context>
chip_gen: v6e
topology: v6e:2x2x1
jax: 0.10.0
libtpu: 0.0.40
codegen_flags: <defaults>
</compile_context>

<pallas_src>
import functools

import jax
import jax.numpy as jnp
from jax.experimental import pallas as pl
from jax.experimental.pallas import tpu as pltpu


def _round_up(x, m):
    return (x + m - 1) // m * m


# --------------------------------------------------------------------------------------------
# Kernels
# --------------------------------------------------------------------------------------------
def _film_kernel_single_k(x_ref, w_ref, b_ref, freq_ref, phase_ref, o_ref, *, compute_dtype):
    """n_k == 1 fast path: no accumulator scratch, single dot + fused FiLM epilogue."""
    x = x_ref[...]
    w = w_ref[...]
    if compute_dtype is not None:
        x = x.astype(compute_dtype)
        w = w.astype(compute_dtype)
    y = jnp.dot(x, w, preferred_element_type=jnp.float32)          # (tm, th) f32
    y = y + b_ref[...].astype(jnp.float32)
    y = freq_ref[...].astype(jnp.float32) * y + phase_ref[...].astype(jnp.float32)
    o_ref[...] = jnp.sin(y).astype(o_ref.dtype)


def _film_kernel_multi_k(x_ref, w_ref, b_ref, freq_ref, phase_ref, o_ref, acc_ref, *,
                         compute_dtype):
    """K-tiled path: f32 accumulator across the innermost 'arbitrary' k axis."""
    k = pl.program_id(3)

    @pl.when(k == 0)
    def _():
        acc_ref[...] = jnp.zeros_like(acc_ref)

    x = x_ref[...]
    w = w_ref[...]
    if compute_dtype is not None:
        x = x.astype(compute_dtype)
        w = w.astype(compute_dtype)
    acc_ref[...] += jnp.dot(x, w, preferred_element_type=jnp.float32)

    @pl.when(k == pl.num_programs(3) - 1)
    def _():
        y = acc_ref[...] + b_ref[...].astype(jnp.float32)
        y = freq_ref[...].astype(jnp.float32) * y + phase_ref[...].astype(jnp.float32)
        o_ref[...] = jnp.sin(y).astype(o_ref.dtype)


# --------------------------------------------------------------------------------------------
# Per-generation tuning and tile selection
# --------------------------------------------------------------------------------------------
def _tpu_tuning():
    """(vmem_budget, vmem_limit_cap, mxu_align, megacore, max_row_tile) for this chip."""
    kind = ""
    try:
        kind = jax.devices()[0].device_kind.lower()
    except Exception:
        pass
    try:
        vmem_cap = int(pltpu.get_tpu_info().vmem_capacity_bytes)
    except Exception:
        vmem_cap = 64 << 20                            # assume smallest (v7x-like) VMEM
    if "v7" in kind:       # 64 MiB VMEM/TC, 2 TCs, 256x256 MXU
        budget, cap, align, megacore, max_rows = 24 << 20, 48 << 20, 256, True, 1024
    elif "v6" in kind:     # 128 MiB VMEM, 1 TC, 256x256 MXU
        budget, cap, align, megacore, max_rows = 64 << 20, 100 << 20, 256, False, 2048
    elif "v5" in kind:     # 128 MiB VMEM, 1 TC, 128x128 MXU, single vst slot
        budget, cap, align, megacore, max_rows = 64 << 20, 100 << 20, 128, False, 2048
    else:                  # unknown -> conservative (v7x-like)
        budget, cap, align, megacore, max_rows = 24 << 20, 48 << 20, 256, False, 1024
    cap = min(cap, max(32 << 20, vmem_cap - (16 << 20)))   # leave headroom for Mosaic scratch
    budget = min(budget, cap - (8 << 20))
    return budget, cap, align, megacore, max_rows


def _choose_tiles(B, S, K, H, x_item, w_item, out_item, budget, align, megacore,
                  max_row_tile, k_tile):
    """Pick (tm, th, tk) and any fallback padding. Prefers divisors of S/K/H (no padding),
    MXU-aligned tm, fully resident W (tk == K) and un-tiled H whenever they fit the budget."""

    def rows_fit(th_, tk_, with_acc):
        fixed = 2 * tk_ * th_ * w_item + 6 * th_ * 4            # W blocks + bias/freq/phase
        per_row = 2 * tk_ * x_item + 2 * th_ * out_item + (4 * th_ if with_acc else 0)
        return max(0, (budget - fixed) // per_row)

    tm_goal = min(max_row_tile, _round_up(S, 8))
    need = min(align, tm_goal)            # smallest row tile we consider "healthy"

    # ---- H tile: keep full H unless it forces tm below one MXU-aligned tile -----------------
    tk_proxy = K if K <= k_tile else k_tile
    acc_proxy = K > k_tile
    if H <= align or rows_fit(H, tk_proxy, acc_proxy) >= need:
        th = H
    else:
        th = align
        while (2 * th <= H and H % (2 * th) == 0
               and rows_fit(2 * th, tk_proxy, acc_proxy) >= need):
            th *= 2
        if H % th != 0 and align > 128 and H % 128 == 0:
            th = 128                      # lane-aligned divisor of H -> avoid padding H
    h_pad = -H % th

    # ---- K tile: keep the whole contraction resident (n_k == 1) whenever W fits -------------
    if K <= k_tile or 2 * K * th * w_item <= budget // 2:
        tk = K
    else:
        tk = k_tile
        for cand in (512, 384, 256, 128):
            if cand <= k_tile and K % cand == 0:
                tk = cand
                break
    k_pad = -K % tk
    n_k = (K + k_pad) // tk

    # ---- row (S) tile: MXU-aligned, preferring a divisor of S (no pad / slice) ---------------
    tm_max = max(8, min(rows_fit(th, tk, n_k > 1), max_row_tile))
    if _round_up(S, 8) <= tm_max:
        tm = S                                            # single full-extent block, no pad
    else:
        step = align if tm_max >= align else (128 if tm_max >= 128 else 8)
        base = (tm_max // step) * step
        tm = base
        for cand in range(base, step - 1, -step):
            if S % cand == 0:
                tm = cand
                break
    s_pad = -S % tm

    # ---- v7x only: ensure >= 2 parallel grid steps for the 2 TensorCores ---------------------
    n_m = (S + s_pad) // tm
    n_h = (H + h_pad) // th
    if megacore and B * n_m * n_h < 2 and tm >= 16:
        tm = max(8, (tm // 2 // 8) * 8)
        s_pad = -S % tm

    return tm, th, tk, s_pad, h_pad, k_pad


# --------------------------------------------------------------------------------------------
# Wrapper
# --------------------------------------------------------------------------------------------
def film_layer(x, weight_kh, bias, freq, phase_shift, *,
               compute_dtype=None, k_tile=512, max_row_tile=None):
    """Pallas TPU FiLMLayer forward:  sin(freq * (x @ W + b) + phase_shift).

    x:            (B, S, K)
    weight_kh:    (K, H)  -- PyTorch nn.Linear stores (H, K); transpose ONCE at load time.
    bias:         (H,)
    freq, phase:  (B, H) or (B, 1, H), broadcast over the sequence axis.
    compute_dtype: optional (e.g. jnp.bfloat16) MXU input dtype; epilogue stays f32.
    returns:      (B, S, H) in x.dtype
    """
    B, S, K = x.shape
    Kw, H = weight_kh.shape
    assert Kw == K, f"weight_kh must be (K, H); got {weight_kh.shape} for K={K}"
    out_dtype = x.dtype

    bias2 = bias.reshape(1, H)
    freq3 = freq.reshape(B, 1, H)
    phase3 = phase_shift.reshape(B, 1, H)

    budget, limit_cap, align, megacore, auto_rows = _tpu_tuning()
    if max_row_tile is None:
        max_row_tile = auto_rows

    x_item = jnp.dtype(x.dtype).itemsize
    w_item = jnp.dtype(weight_kh.dtype).itemsize
    out_item = jnp.dtype(out_dtype).itemsize

    tm, th, tk, s_pad, h_pad, k_pad = _choose_tiles(
        B, S, K, H, x_item, w_item, out_item, budget, align, megacore, max_row_tile, k_tile)

    Sp, Hp, Kp = S + s_pad, H + h_pad, K + k_pad
    if s_pad or k_pad:
        x = jnp.pad(x, ((0, 0), (0, s_pad), (0, k_pad)))
    if h_pad or k_pad:
        weight_kh = jnp.pad(weight_kh, ((0, k_pad), (0, h_pad)))
    if h_pad:
        bias2 = jnp.pad(bias2, ((0, 0), (0, h_pad)))
        freq3 = jnp.pad(freq3, ((0, 0), (0, 0), (0, h_pad)))
        phase3 = jnp.pad(phase3, ((0, 0), (0, 0), (0, h_pad)))

    n_m, n_h, n_k = Sp // tm, Hp // th, Kp // tk

    footprint = (2 * tm * tk * x_item            # x blocks (double-buffered)
                 + 2 * tk * th * w_item          # W blocks
                 + 2 * tm * th * out_item        # out blocks
                 + (tm * th * 4 if n_k > 1 else 0)   # f32 accumulator (only when K is tiled)
                 + 6 * th * 4)                   # bias / freq / phase blocks
    vmem_limit = int(min(limit_cap, max(32 << 20, footprint + (8 << 20))))

    if n_k == 1:
        kernel = functools.partial(_film_kernel_single_k, compute_dtype=compute_dtype)
        grid = (B, n_m, n_h)
        in_specs = [
            pl.BlockSpec((None, tm, tk), lambda b, i, j: (b, i, 0)),   # x
            pl.BlockSpec((tk, th), lambda b, i, j: (0, j)),            # W (K, H)
            pl.BlockSpec((1, th), lambda b, i, j: (0, j)),             # bias
            pl.BlockSpec((None, 1, th), lambda b, i, j: (b, 0, j)),    # freq
            pl.BlockSpec((None, 1, th), lambda b, i, j: (b, 0, j)),    # phase_shift
        ]
        out_specs = pl.BlockSpec((None, tm, th), lambda b, i, j: (b, i, j))
        scratch = []
        semantics = ("parallel", "parallel", "parallel")
    else:
        kernel = functools.partial(_film_kernel_multi_k, compute_dtype=compute_dtype)
        grid = (B, n_m, n_h, n_k)
        in_specs = [
            pl.BlockSpec((None, tm, tk), lambda b, i, j, k: (b, i, k)),   # x
            pl.BlockSpec((tk, th), lambda b, i, j, k: (k, j)),            # W (K, H)
            pl.BlockSpec((1, th), lambda b, i, j, k: (0, j)),             # bias
            pl.BlockSpec((None, 1, th), lambda b, i, j, k: (b, 0, j)),    # freq
            pl.BlockSpec((None, 1, th), lambda b, i, j, k: (b, 0, j)),    # phase_shift
        ]
        out_specs = pl.BlockSpec((None, tm, th), lambda b, i, j, k: (b, i, j))
        scratch = [pltpu.VMEM((tm, th), jnp.float32)]
        semantics = ("parallel", "parallel", "parallel", "arbitrary")

    out = pl.pallas_call(
        kernel,
        out_shape=jax.ShapeDtypeStruct((B, Sp, Hp), out_dtype),
        grid_spec=pltpu.PrefetchScalarGridSpec(
            num_scalar_prefetch=0,
            grid=grid,
            in_specs=in_specs,
            out_specs=out_specs,
            scratch_shapes=scratch,
        ),
        compiler_params=pltpu.CompilerParams(
            dimension_semantics=semantics,
            vmem_limit_bytes=vmem_limit,
        ),
    )(x, weight_kh, bias2, freq3, phase3)

    if s_pad or h_pad:
        out = out[:, :S, :H]
    return out


# --------------------------------------------------------------------------------------------
# Reference + demo
# --------------------------------------------------------------------------------------------
def _film_ref(x, weight_hk, bias, freq, phase_shift):
    B = x.shape[0]
    H = weight_hk.shape[0]
    y = jnp.einsum("bsk,hk->bsh", x.astype(jnp.float32), weight_hk.astype(jnp.float32))
    y = y + bias.astype(jnp.float32)
    y = (freq.reshape(B, 1, H).astype(jnp.float32) * y
         + phase_shift.reshape(B, 1, H).astype(jnp.float32))
    return jnp.sin(y).astype(x.dtype)


if __name__ == "__main__":
    key = jax.random.PRNGKey(0)
    k_x, k_w, k_b, k_f, k_p = jax.random.split(key, 5)

    batch, seq, input_dim, hidden_dim = 2, 8, 16, 32

    x = jax.random.normal(k_x, (batch, seq, input_dim), dtype=jnp.float32)
    weight = jax.random.normal(k_w, (hidden_dim, input_dim), dtype=jnp.float32) * 0.1  # PyTorch (H, K)
    bias = jax.random.normal(k_b, (hidden_dim,), dtype=jnp.float32) * 0.1
    # FiLM conditioning (per batch element), broadcast over the sequence axis.
    freq = jax.random.normal(k_f, (batch, 1, hidden_dim), dtype=jnp.float32) * 5.0
    phase = jax.random.normal(k_p, (batch, 1, hidden_dim), dtype=jnp.float32)

    # Pre-store the Linear weight in (K, H) layout once, outside the per-call path.
    weight_kh = jnp.asarray(weight.T)

    y = film_layer(x, weight_kh, bias, freq, phase)
    y = jax.block_until_ready(y)

    y_ref = _film_ref(x, weight, bias, freq, phase)
    assert y.shape == (batch, seq, hidden_dim) and y.dtype == x.dtype
    assert jnp.allclose(y, y_ref, atol=1e-5, rtol=1e-5)

    print("KERNEL_OK")
</pallas_src>

<mosaic_0001>
module attributes {stable_mosaic.version = 11 : i64} {
  func.func @_film_kernel_single_k(%arg0: i32, %arg1: i32, %arg2: i32, %arg3: memref<1x8x16xf32, #tpu.memory_space<vmem>>, %arg4: memref<16x32xf32, #tpu.memory_space<vmem>>, %arg5: memref<1x32xf32, #tpu.memory_space<vmem>>, %arg6: memref<1x1x32xf32, #tpu.memory_space<vmem>>, %arg7: memref<1x1x32xf32, #tpu.memory_space<vmem>>, %arg8: memref<1x8x32xf32, #tpu.memory_space<vmem>>) attributes {dimension_semantics = [#tpu.dimension_semantics<parallel>, #tpu.dimension_semantics<parallel>, #tpu.dimension_semantics<parallel>], iteration_bounds = array<i64: 2, 1, 1>, scalar_prefetch = 0 : i64, scratch_operands = 0 : i64, tpu.core_type = #tpu.core_type<tc>, window_params = [{transform_indices = @transform_0, window_bounds = array<i64: 1, 8, 16>}, {transform_indices = @transform_1, window_bounds = array<i64: 16, 32>}, {transform_indices = @transform_2, window_bounds = array<i64: 1, 32>}, {transform_indices = @transform_3, window_bounds = array<i64: 1, 1, 32>}, {transform_indices = @transform_4, window_bounds = array<i64: 1, 1, 32>}, {transform_indices = @transform_5, window_bounds = array<i64: 1, 8, 32>}]} {
    %c0 = arith.constant 0 : index
    %c0_0 = arith.constant 0 : index
    %c0_1 = arith.constant 0 : index
    %0 = vector.load %arg3[%c0, %c0_0, %c0_1] : memref<1x8x16xf32, #tpu.memory_space<vmem>>, vector<1x8x16xf32>
    %1 = vector.shape_cast %0 : vector<1x8x16xf32> to vector<8x16xf32>
    %c0_2 = arith.constant 0 : index
    %c0_3 = arith.constant 0 : index
    %2 = vector.load %arg4[%c0_2, %c0_3] : memref<16x32xf32, #tpu.memory_space<vmem>>, vector<16x32xf32>
    %cst = arith.constant dense<0.000000e+00> : vector<8x32xf32>
    %3 = tpu.matmul %1, %2, %cst {dimension_numbers = #tpu.dot_dimension_numbers<[1], [0], [0], [1], [0, 0, 1, 1], [], []>} : vector<8x16xf32>, vector<16x32xf32>, vector<8x32xf32> -> vector<8x32xf32>
    %c0_4 = arith.constant 0 : index
    %c0_5 = arith.constant 0 : index
    %4 = vector.load %arg5[%c0_4, %c0_5] : memref<1x32xf32, #tpu.memory_space<vmem>>, vector<1x32xf32>
    %5 = vector.broadcast %4 : vector<1x32xf32> to vector<8x32xf32>
    %6 = arith.addf %3, %5 : vector<8x32xf32>
    %c0_6 = arith.constant 0 : index
    %c0_7 = arith.constant 0 : index
    %c0_8 = arith.constant 0 : index
    %7 = vector.load %arg6[%c0_6, %c0_7, %c0_8] : memref<1x1x32xf32, #tpu.memory_space<vmem>>, vector<1x1x32xf32>
    %8 = vector.shape_cast %7 : vector<1x1x32xf32> to vector<1x32xf32>
    %9 = vector.broadcast %8 : vector<1x32xf32> to vector<8x32xf32>
    %10 = arith.mulf %9, %6 : vector<8x32xf32>
    %c0_9 = arith.constant 0 : index
    %c0_10 = arith.constant 0 : index
    %c0_11 = arith.constant 0 : index
    %11 = vector.load %arg7[%c0_9, %c0_10, %c0_11] : memref<1x1x32xf32, #tpu.memory_space<vmem>>, vector<1x1x32xf32>
    %12 = vector.shape_cast %11 : vector<1x1x32xf32> to vector<1x32xf32>
    %13 = vector.broadcast %12 : vector<1x32xf32> to vector<8x32xf32>
    %14 = arith.addf %10, %13 : vector<8x32xf32>
    %15 = math.sin %14 : vector<8x32xf32>
    %c0_12 = arith.constant 0 : index
    %c0_13 = arith.constant 0 : index
    %c0_14 = arith.constant 0 : index
    %16 = vector.load %arg8[%c0_12, %c0_13, %c0_14] : memref<1x8x32xf32, #tpu.memory_space<vmem>>, vector<1x8x32xf32>
    %17 = vector.shape_cast %16 : vector<1x8x32xf32> to vector<8x32xf32>
    %18 = vector.shape_cast %15 : vector<8x32xf32> to vector<1x8x32xf32>
    tpu.vector_store %arg8[%c0_12, %c0_13, %c0_14], %18 {strides = array<i32>} : memref<1x8x32xf32, #tpu.memory_space<vmem>>, vector<1x8x32xf32>,
    return
  }
  func.func @transform_0(%arg0: i32, %arg1: i32, %arg2: i32) -> (i32, i32, i32) {
    %c0_i32 = arith.constant 0 : i32
    %c0_i32_0 = arith.constant 0 : i32
    return %arg0, %arg1, %c0_i32 : i32, i32, i32
  }
  func.func @transform_1(%arg0: i32, %arg1: i32, %arg2: i32) -> (i32, i32) {
    %c0_i32 = arith.constant 0 : i32
    %c0_i32_0 = arith.constant 0 : i32
    return %c0_i32, %arg2 : i32, i32
  }
  func.func @transform_2(%arg0: i32, %arg1: i32, %arg2: i32) -> (i32, i32) {
    %c0_i32 = arith.constant 0 : i32
    %c0_i32_0 = arith.constant 0 : i32
    return %c0_i32, %arg2 : i32, i32
  }
  func.func @transform_3(%arg0: i32, %arg1: i32, %arg2: i32) -> (i32, i32, i32) {
    %c0_i32 = arith.constant 0 : i32
    %c0_i32_0 = arith.constant 0 : i32
    return %arg0, %c0_i32, %arg2 : i32, i32, i32
  }
  func.func @transform_4(%arg0: i32, %arg1: i32, %arg2: i32) -> (i32, i32, i32) {
    %c0_i32 = arith.constant 0 : i32
    %c0_i32_0 = arith.constant 0 : i32
    return %arg0, %c0_i32, %arg2 : i32, i32, i32
  }
  func.func @transform_5(%arg0: i32, %arg1: i32, %arg2: i32) -> (i32, i32, i32) {
    %c0_i32 = arith.constant 0 : i32
    return %arg0, %arg1, %arg2 : i32, i32, i32
  }
}

</mosaic_0001>

<bundles_post_ra>
// kernel: tpu_custom_call.1
= control target key start
LH: loop header
LB: loop body
LE: loop exit
PB: predicated region body
PF: predicated region fallthrough
CT: control target
= control target key end

     0   :  { %s1223_s0 = inlined_call_operand.hbm [shape: f32[2,8,16], index: 0, kind: input, shape index: {}]   ;;  %s1224_s1 = inlined_call_operand.hbm [shape: f32[16,32], index: 1, kind: input, shape index: {}]   ;;  %s1225_s2 = inlined_call_operand.vmem [shape: f32[1,32], index: 2, kind: input, shape index: {}]   ;;  %s1226_s3 = inlined_call_operand.vmem [shape: f32[2,1,32], index: 3, kind: input, shape index: {}]   ;;  %s1227_s4 = inlined_call_operand.vmem [shape: f32[2,1,32], index: 4, kind: input, shape index: {}]   ;;  %s1228_s5 = inlined_call_operand.hbm [shape: f32[2,8,32], index: 5, kind: output, shape index: {}]  }
   0x1   :  { %1231 = sst [smem:[#allocation12_spill]] %s1224_s1 }
   0x2   :  { %10 = vsyncpa [#allocation3], 0 }
   0x3   :  { %12 = vsyncpa [#allocation3 + $0x1], 0 }
   0x4   :  { %13 = vsyncpa [#allocation6], 0 }
   0x5   :  { %14 = vsyncpa [#allocation4], 0 }
   0x6   :  { %16 = vsyncpa [#allocation4 + $0x1], 0  ;;  %s1014_s18 = smov 0   ;;  %s1016_s19 = smov 0  }
   0x7   :  { %s1018_s20 = smov 0   ;;  %s1020_s21 = smov 0  }
   0x8   :  { %s1022_s22 = smov 0   ;;  %s1024_s23 = smov 0  }
   0x9 LB: > { %s706_s24 = sadd.s32 4294967295, %s969_s23   ;;  %s707_s25 = sadd.s32 4294967294, %s969_s23   ;;  %s969_s23 = sphi %s1024_s23, %s22_s23   ;;  %s965_s22 = sphi %s1022_s22, %s1251_s22   ;;  %s961_s21 = sphi %s1020_s21, %s1250_s21   ;;  %s957_s20 = sphi %s1018_s20, %s1249_s20   ;;  %s953_s19 = sphi %s1016_s19, %s1248_s19   ;;  %s949_s18 = sphi %s1014_s18, %s1247_s18  }
   0xa   : > { %p63_p0 = scmp.ne.s32.totalorder %s953_s19, %s949_s18  ;;  %p1048_p1 = scmp.eq.s32.totalorder %s706_s24, 0 }
   0xb   : > { %p1052_p2 = scmp.eq.s32.totalorder %s706_s24, 1  ;;  %p205_p3 = scmp.eq.s32.totalorder %s707_s25, 1 }
   0xc   : > { %p1058_p4 = por %p1048_p1, %p63_p0  ;;  %p708_p5 = scmp.ge.s32.totalorder %s969_s23, 1 }
   0xd   : > { %p1063_p6 = por %p205_p3, %p63_p0  ;;  %p212_p7 = scmp.lt.s32.totalorder %s969_s23, 3 }
   0xe   : > { %s1234_s28 = scalar_select %p1058_p4, 1, 0 }
   0xf   : > { %s1235_s29 = scalar_select %p1063_p6, 1, 0 }
  0x10   : > { %p1068_p8 = pnand %p708_p5, %p212_p7  ;;  %s971_s6 = smov [#allocation5]  }
  0x11   : > { %s226_s7 = sshll.u32 %s971_s6, 4  ;;  %s41_s9 = sadd.s32 1, %s965_s22  ;;  %s227_s7 = int_to_ptr.vmem [resolvable:$true] %s226_s7 }
  0x12   : > { %p752_p9 = pneg %p1068_p8  ;;  %s842_s10 = scalar_lea.vmem %s227_s7, 256 }
  0x13   : > { %p843_p13 = scmp.ne.s32.totalorder %s227_s7, %s842_s10  ;;  %p850_p5 = scmp.lt.s32.totalorder %s227_s7, %s227_s7 }
  0x14   : > { %p1077_p11 = pnand %p752_p9, %p1048_p1  ;;  %p851_p7 = scmp.lt.s32.totalorder %s842_s10, %s842_s10 }
  0x16   : > { %p833_p12 = pneg %p1077_p11  ;;  %p852_p6 = por %p851_p7, %p850_p5 }
  0x18   : > { %p845_p0 = pnand %p843_p13, %p833_p12 }
  0x1a   : > { %p846_p3 = pneg %p845_p0 }
  0x1c   : > { %p853_p4 = pnand %p852_p6, %p846_p3 }
  0x1e   : > { %856 = shalt.err (!%p853_p4)
}
  0x1f   : > { %s972_s11 = smov 128   ;;  %s973_s12 = smov 8  }
  0x20   : > { %s1238_s1 = sld [smem:[#allocation12_spill]]  ;;  %p43_p6 = scmp.ge.s32.totalorder %s41_s9, 2 }
  0x21   : > { %s50_s15 = sadd.s32 1, %s957_s20  ;;  %p57_p4 = scmp.ne.s32.totalorder %s957_s20, %s953_s19 }
  0x22   : > { %p58_p9 = scmp.eq.s32.totalorder %s969_s23, 0  ;;  %s1253_s9 = smov (%p43_p6, %s41_s9), 0 }
  0x23   : > { %1239 = sst [smem:[#allocation11_spill]] %s1253_s9  ;;  %p1101_p13 = por %p1052_p2, %p57_p4 }
  0x24   : > { %p1095_p12 = por %p58_p9, %p57_p4  ;;  %s45_s24 = ssub.s32 %s965_s22, %s1253_s9 }
  0x25   : > { %p765_p0 = scmp.lt.s32.totalorder %s969_s23, 2  ;;  %s246_s25 = sand.u32 1, %s957_s20  }
  0x26   : > { %755 = dma.hbm_to_vmem [thread:$0]  (!%p1077_p11), %s1238_s1, 256, %s227_s7, [#allocation6], %s972_s11, %s972_s11, %s973_s12  }
  0x27   : > { %p48_p11 = scmp.eq.s32.totalorder %s45_s24, 0  ;;  %s712_s6 = sshll.u32 %s246_s25, 3 }
  0x28   : > { %s713_s8 = sshll.u32 %s965_s22, 7  ;;  %s250_s13 = scalar_lea.vmem [#allocation2], %s712_s6 }
  0x29   : > { %s1110_s7 = scalar_select %p48_p11, %s957_s20, %s50_s15  }
  0x2a   : > { %s256_s12 = scalar_lea.hbm %s1223_s0, %s713_s8  ;;  %s258_s14 = sshll.u32 %s250_s13, 4  ;;  %s259_s14 = int_to_ptr.vmem [resolvable:$true] %s258_s14 }
  0x2b   : > { %p1118_p2 = pnand %p765_p0, %p1095_p12  ;;  %s247_s1 = scalar_lea.sflag [#allocation3], %s246_s25 }
  0x2c   : > { %s870_s24 = scalar_lea.vmem %s259_s14, 128  ;;  %s974_s15 = smov [#allocation2]  }
  0x2d   : > { %p859_p3 = pneg %p1118_p2  ;;  %p871_p5 = scmp.ne.s32.totalorder %s259_s14, %s870_s24 }
  0x2e   : > { %s875_s9 = sshll.u32 %s974_s15, 4  ;;  %s876_s9 = int_to_ptr.vmem [resolvable:$false] %s875_s9 }
  0x2f   : > { %p873_p7 = pnand %p871_p5, %p859_p3  ;;  %s877_s8 = scalar_lea.vmem %s876_s9, 256 }
  0x30   : > { %p878_p4 = scmp.lt.s32.totalorder %s259_s14, %s876_s9  ;;  %p879_p9 = scmp.lt.s32.totalorder %s877_s8, %s870_s24 }
  0x31   : > { %p874_p6 = pneg %p873_p7 }
  0x32   : > { %p880_p11 = por %p879_p9, %p878_p4 }
  0x34   : > { %p881_p10 = pnand %p880_p11, %p874_p6 }
  0x36   : > { %884 = shalt.err (!%p881_p10)
}
  0x37   : > { %759 = dma.hbm_to_vmem [thread:$0]  (!%p1118_p2), %s256_s12, 128, %s259_s14, %s247_s1  }
  0x38   : > { %285 = sbr.rel (%p1068_p8) target bundleno = 363 (0x16b), region = 40  ;;  %s1129_s16 = sand.u32 (!%p1068_p8), 1, %s953_s19  }
  0x39   : > { %s715_s25 = sshll.u32 (!%p1068_p8), %s1129_s16, 3  ;;  %s288_s6 = scalar_lea.sflag (!%p1068_p8), [#allocation3], %s1129_s16 }
  0x3a   : > { %s291_s9 = scalar_lea.vmem (!%p1068_p8), [#allocation2], %s715_s25  ;;  %p1243_p12 = scmp.ne.s32.totalorder (!%p1068_p8), %s1234_s28, 0 }
  0x3d   : > { %936 = dma.done.wait (%p1243_p12), %s288_s6, 128  }
  0x3e   : > { %938 = vsyncadd (%p1243_p12), %s288_s6, 4294967168 }
  0x3f   : > { %940 = dma.done.wait (%p1048_p1), [#allocation6], 256  }
  0x40   : > { %942 = vsyncadd (%p1048_p1), [#allocation6], 4294967040  ;;  %v975_v0 = vmov 0.0   ;;  %vm976_vm0 = vmmov 0   ;;  %v354_v1 = vld [vmem:[#allocation5 + $0x8] sm:$0xff]  ;;  %v353_v2 = vld [vmem:[#allocation5] sm:$0xff] }
  0x41   : > { %733 = vmatprep.subr.mxu0 %v975_v0  ;;  %737 = vmatprep.mubr.msk.f32.mxu0 %vm976_vm0, %v975_v0  ;;  %v352_v3 = vld [vmem:[%s291_s9] sm:$0xff]  ;;  %vm362_vm1 = vcmask 130048   ;;  %p340_p8 = scmp.lt.s32.totalorder %s961_s21, 1  ;;  %v977_v22 = vmov 683565275   ;;  %s727_s27 = sshll.u32 %s961_s21, 7 }
  0x42   : > { %734 = vmatpush3.msra.mxu0 %v354_v1  ;;  %v718_v4 = vld [vmem:[%s1225_s2] ss:$0 sm:$0xff]  ;;  %v978_v24 = vmov 2475754826   ;;  %v979_v27 = vmov 2131351028   ;;  %s1181_s9 = scalar_lea.hbm %s1228_s5, %s727_s27 }
  0x43   : > { %735 = vmatprep.subr.mxu0 %v975_v0  ;;  %s341_s1 = scalar_select %p340_p8, %s961_s21, 1  ;;  %v980_v30 = vmov 2102212464   ;;  %v981_v33 = vmov 920167782   ;;  %vm556_vm14 = vcmask 261120  }
  0x44   : > { %736 = vmatpush3.msra.mxu0 %v353_v2  ;;  %v982_v36 = vmov 1326507024   ;;  %s336_s24 = scalar_lea.vmem [#allocation7], %s715_s25  ;;  %s559_s21 = scalar_lea.sflag [#allocation4], %s1129_s16 }
  0x45   : > { %738 = vmatmul.mubr.msk.f32.vlgmr.msra.gmra.mxu0 %vm362_vm1, %v352_v3  ;;  %s345_s26 = scalar_lea.vmem %s1226_s3, %s341_s1  ;;  %s351_s14 = scalar_lea.vmem %s1227_s4, %s341_s1 }
  0x46   : > { %v720_v6 = vld [vmem:[%s345_s26] ss:$0 sm:$0xff]  ;;  %s574_s15 = sshll.u32 %s336_s24, 4  ;;  %s983_s1 = smov [#allocation7]   ;;  %s575_s15 = int_to_ptr.vmem [resolvable:$true] %s574_s15 }
  0x47   : > { %v721_v8 = vld [vmem:[%s351_s14] ss:$0 sm:$0xff]  ;;  %s885_s25 = scalar_lea.vmem %s575_s15, 128  ;;  %s889_s28 = sshll.u32 %s983_s1, 4  ;;  %s890_s28 = int_to_ptr.vmem [resolvable:$false] %s889_s28 }
  0x48   : > { %p886_p1 = scmp.ne.s32.totalorder %s575_s15, %s885_s25  ;;  %s891_s30 = scalar_lea.vmem %s890_s28, 256 }
  0x49   : > { %p892_p2 = scmp.lt.s32.totalorder %s575_s15, %s890_s28  ;;  %p893_p3 = scmp.lt.s32.totalorder %s891_s30, %s885_s25 }
  0x4a   : > { %p887_p10 = pnand %p886_p1, %p1101_p13 }
  0x4b   : > { %p894_p5 = por %p893_p3, %p892_p2 }
  0x4c   : > { %p888_p0 = pneg %p887_p10 }
  0x4e   : > { %p895_p7 = pnand %p894_p5, %p888_p0 }
 0x105   : > { %v432_v5 = vpop.f32.mrf.mxu0 }
 0x106   : > { %v433_v7 = vadd.f32 %v718_v4, %v432_v5 }
 0x107   : > { %v739_v9 = vpop.f32.mrf.mxu0 }
 0x108   : > { %v443_v10 = vmul.f32 %v720_v6, %v433_v7 }
 0x10a   : > { %v1154_v11 = vadd.f32 %v721_v8, %v443_v10 }
 0x10c   : > { %v455_v12 = vand.u32 2139095040, %v1154_v11  ;;  %v452_v16 = vand.u32 2147483647, %v1154_v11  ;;  %vm454_vm9 = vcmp.lt.s32.totalorder %v1154_v11, 0  ;;  %vm544_vm15 = vweird.f32 %v1154_v11 }
 0x10e   : > { %v456_v13 = vshrl.u32 %v455_v12, 23  ;;  %v459_v19 = vand.u32 8388607, %v452_v16  ;;  %vm453_vm10 = vcmp.le.f32.partialorder %v452_v16, 0.7853982 }
 0x110   : > { %v722_v14 = vadd.s32 4294967169, %v456_v13  ;;  %v460_v38 = vor.u32 8388608, %v459_v19 }
 0x112   : > { %v462_v15 = vadd.s32 1, %v722_v14  ;;  %v500_v52 = vshll.u32 %v460_v38, 8 }
 0x114   : > { %vm463_vm2 = vcmp.gt.s32.totalorder %v462_v15, 0 }
 0x115   : > { %v464_v17 = vsel %vm463_vm2, %v462_v15, 0 }
 0x116   : > { %v466_v18 = vand.u32 31, %v464_v17  ;;  %v465_v21 = vshrl.u32 %v464_v17, 5 }
 0x118   : > { %v467_v20 = vsub.s32 32, %v466_v18  ;;  %v469_v23 = vshll.u32 %v977_v22, %v466_v18  ;;  %v472_v25 = vshll.u32 %v978_v24, %v466_v18  ;;  %v475_v29 = vshll.u32 %v979_v27, %v466_v18 }
 0x119   : > { %v478_v32 = vshll.u32 %v980_v30, %v466_v18  ;;  %v481_v35 = vshll.u32 %v981_v33, %v466_v18  ;;  %vm484_vm3 = vcmp.lt.s32.totalorder %v465_v21, 1  ;;  %vm487_vm4 = vcmp.lt.s32.totalorder %v465_v21, 4 }
 0x11a   : > { %v470_v26 = vshrl.u32 %v978_v24, %v467_v20  ;;  %v473_v28 = vshrl.u32 %v979_v27, %v467_v20  ;;  %v476_v31 = vshrl.u32 %v980_v30, %v467_v20  ;;  %v479_v34 = vshrl.u32 %v981_v33, %v467_v20 }
 0x11b   : > { %v482_v37 = vshrl.u32 %v982_v36, %v467_v20  ;;  %v468_v47 = vshrl.u32 %v977_v22, %v467_v20  ;;  %vm486_vm5 = vcmp.lt.s32.totalorder %v465_v21, 3  ;;  %vm485_vm6 = vcmp.lt.s32.totalorder %v465_v21, 2 }
 0x11c   : > { %v471_v39 = vor.u32 %v470_v26, %v469_v23  ;;  %v474_v40 = vor.u32 %v473_v28, %v472_v25  ;;  %v477_v41 = vor.u32 %v476_v31, %v475_v29  ;;  %v480_v42 = vor.u32 %v479_v34, %v478_v32 }
 0x11d   : > { %v483_v43 = vor.u32 %v482_v37, %v481_v35 }
 0x11e   : > { %v489_v44 = vsel %vm487_vm4, %v477_v41, 2102212464  ;;  %v492_v45 = vsel %vm484_vm3, %v471_v39, %v474_v40  ;;  %v496_v46 = vsel %vm484_vm3, %v474_v40, %v477_v41  ;;  %v493_v48 = vsel %vm487_vm4, %v480_v42, 920167782 }
 0x11f   : > { %v497_v49 = vsel %vm487_vm4, %v483_v43, 1326507024  ;;  %v494_v50 = vsel %vm486_vm5, %v477_v41, %v493_v48  ;;  %v488_v53 = vsel %vm484_vm3, %v468_v47, %v471_v39  ;;  %v490_v54 = vsel %vm486_vm5, %v474_v40, %v489_v44 }
 0x120   : > { %v498_v51 = vsel %vm486_vm5, %v480_v42, %v497_v49  ;;  %v495_v55 = vsel %vm485_vm6, %v492_v45, %v494_v50  ;;  %v491_v61 = vsel %vm485_vm6, %v488_v53, %v490_v54 }
 0x121   : > { %v499_v56 = vsel %vm485_vm6, %v496_v46, %v498_v51  ;;  %v1163_v59 = vmul.u32.u64.low %v500_v52, %v495_v55  ;;  %v1164_v60 = vmul.u32.u64.high %v500_v52, %v495_v55, %v1163_v59  ;;  %v507_v63 = vmul.u32 %v500_v52, %v491_v61 }
 0x122   : > { %v1160_v57 = vmul.u32.u64.low %v500_v52, %v499_v56  ;;  %v1161_v58 = vmul.u32.u64.high %v500_v52, %v499_v56, %v1160_v57 }
 0x123   : > { %v510_v62 = vadd.s32 1, %v1164_v60 }
 0x124   : > { %vm509_vm7 = vc.u32 %v1161_v58, %v1163_v59  ;;  %v508_v12 = vadd.s32 %v1163_v59, %v1161_v58 }
 0x125   : > { %v511_v0 = vsel %vm509_vm7, %v510_v62, %v1164_v60 }
 0x126   : > { %v512_v1 = vadd.s32 %v511_v0, %v507_v63 }
 0x128   : > { %v513_v2 = vadd.s32 536870912, %v512_v1 }
 0x12a   : > { %v514_v3 = vshrl.u32 %v513_v2, 30 }
 0x12c   : > { %v515_v4 = vshll.u32 %v514_v3, 30  ;;  %v538_v26 = vsub.s32 4, %v514_v3 }
 0x12e   : > { %v516_v5 = vsub.s32 %v512_v1, %v515_v4  ;;  %v539_v29 = vsel %vm454_vm9, %v538_v26, %v514_v3 }
 0x12f   : > { %v541_v30 = vsel %vm453_vm10, 0, %v539_v29 }
 0x130   : > { %v518_v6 = vsub.s32 0, %v516_v5  ;;  %v545_v31 = vadd.s32 3, %v541_v30 }
 0x132   : > { %v723_v7 = vmin.u32 %v518_v6, %v516_v5  ;;  %v546_v32 = vand.u32 3, %v545_v31 }
 0x134   : > { %v520_v8 = vclz %v723_v7  ;;  %vm551_vm11 = vcmp.eq.s32.totalorder %v546_v32, 2  ;;  %vm548_vm12 = vcmp.eq.s32.totalorder %v546_v32, 0  ;;  %vm547_vm13 = vcmp.lt.s32.totalorder %v546_v32, 2 }
 0x136   : > { %v724_v9 = vadd.s32 4294967294, %v520_v8 }
 0x138   : > { %vm725_vm8 = vcmp.lt.s32.totalorder %v724_v9, 0 }
 0x139   : > { %v523_v10 = vsel %vm725_vm8, 0, %v724_v9 }
 0x13a   : > { %v524_v13 = vsub.s32 32, %v523_v10  ;;  %v528_v14 = vsub.s32 4294967266, %v523_v10  ;;  %v525_v15 = vshll.u32 %v516_v5, %v523_v10 }
 0x13c   : > { %v526_v17 = vshrl.u32 %v508_v12, %v524_v13  ;;  %v529_v18 = vadd.s32 127, %v528_v14 }
 0x13e   : > { %v527_v19 = vor.u32 %v526_v17, %v525_v15  ;;  %v530_v20 = vshll.u32 %v529_v18, 23 }
 0x140   : > { %v531_v21 = vor.u32 4788187, %v530_v20  ;;  %v534_v23 = vcvt.s32.f32 %v527_v19 }
 0x142   : > { %v532_v22 = vand.u32 2147483647, %v531_v21 }
 0x144   : > { %v535_v24 = vmul.f32 %v534_v23, %v532_v22 }
 0x146   : > { %v536_v25 = vxor.u32 2147483648, %v535_v24 }
 0x148   : > { %v537_v27 = vsel %vm454_vm9, %v536_v25, %v535_v24 }
 0x149   : > { %v540_v28 = vsel %vm453_vm10, %v1154_v11, %v537_v27 }
 0x14a   : > { %827 = vcosq.f32 %v540_v28 }
 0x14b   : > { %829 = vsinq.f32 %v540_v28 }
 0x157   : > { %v828_v33 = vpop.eup %827 }
 0x158   : > { %v830_v34 = vpop.eup %829  ;;  %v552_v35 = vxor.u32 2147483648, %v828_v33 }
 0x159   : > { %v549_v36 = vxor.u32 2147483648, %v830_v34 }
 0x15a   : > { %v553_v16 = vsel %vm551_vm11, %v552_v35, %v830_v34 }
 0x15b   : > { %v550_v37 = vsel %vm548_vm12, %v828_v33, %v549_v36 }
 0x15c   : > { %v554_v38 = vsel %vm547_vm13, %v550_v37, %v553_v16 }
 0x15d   : > { %v555_v39 = vsel %vm544_vm15, nan, %v554_v38 }
 0x15e   : > { %557 = vst.msk [vmem:[%s336_s24] sm:$0xff] %vm556_vm14, %v555_v39 }
 0x15f   : > { %898 = shalt.err (!%p895_p7)
}
 0x160   : > { %s899_s26 = scalar_lea.hbm %s1181_s9, 128  ;;  %s903_s11 = scalar_lea.hbm %s1228_s5, 256 }
 0x161   : > { %p900_p6 = scmp.ne.s32.totalorder %s1181_s9, %s899_s26  ;;  %p904_p11 = scmp.lt.s32.totalorder %s1181_s9, %s1228_s5 }
 0x162   : > { %p905_p12 = scmp.lt.s32.totalorder %s903_s11, %s899_s26 }
 0x163   : > { %p901_p4 = pnand %p900_p6, %p1101_p13 }
 0x164   : > { %p906_p8 = por %p905_p12, %p904_p11 }
 0x165   : > { %p902_p9 = pneg %p901_p4 }
 0x167   : > { %p907_p1 = pnand %p906_p8, %p902_p9 }
 0x169   : > { %910 = shalt.err (!%p907_p1)
}
 0x16a   : > { %750 = dma.vmem_to_hbm [thread:$0]  (%p1101_p13), %s575_s15, 128, %s1181_s9, %s559_s21  }
 0x16b PF: > { %s586_s14 = sand.u32 1, %s949_s18   ;;  %p1244_p10 = scmp.ne.s32.totalorder %s1235_s29, 0 }
 0x16c   : > { %p1245_p0 = scmp.ge.s32.totalorder %s969_s23, 2  ;;  %s587_s27 = scalar_lea.sflag [#allocation4], %s586_s14 }
 0x16e   : > { %p761_p2 = pnand %p1245_p0, %p1244_p10 }
 0x170   : > { %p762_p3 = pneg %p761_p2 }
 0x172   : > { %944 = dma.done.wait (%p762_p3), %s587_s27, 128  }
 0x173   : > { %946 = vsyncadd (%p762_p3), %s587_s27, 4294967168  ;;  %s22_s23 = sadd.s32 1, %s969_s23   ;;  %s1246_s17 = sld [smem:[#allocation11_spill]] }
 0x174   : > { %p19_p5 = scmp.ge.s32.totalorder %s22_s23, 4   ;;  %s1247_s18 = smov %s953_s19 }
 0x175   : > { %s1248_s19 = smov %s957_s20  ;;  %s1249_s20 = smov %s1110_s7 }
 0x176   : > { %s1250_s21 = smov %s965_s22  ;;  %21 = sbr.rel (!%p19_p5) target bundleno = 9 (0x9), region = 99 }
 0x179   : > { %s1251_s22 = smov %s1246_s17 }
 0x17b   :  { %592 = vsyncpa [#allocation3], 1 }
 0x17c   :  { %594 = vsyncpa [#allocation3 + $0x1], 1 }
 0x17d   :  { %595 = vsyncpa [#allocation6], 1 }
 0x17e   :  { %596 = vsyncpa [#allocation4], 1 }
 0x17f   :  { %598 = vsyncpa [#allocation4 + $0x1], 1 }

</bundles_post_ra>
